<compile_context>
chip_gen: v7x
topology: tpu7x:2x2x1
jax: 0.10.0
libtpu: 0.0.40
codegen_flags: <defaults>
</compile_context>

<pallas_src>
import functools

import jax
import jax.numpy as jnp
from jax.experimental import pallas as pl
from jax.experimental.pallas import tpu as pltpu


def _round_up(x, m):
    return ((x + m - 1) // m) * m


def _mlp_kernel(x_ref, *refs):
    """Fused MLP forward for one batch tile.

    refs = (w0, b0, w1, b1, ..., wL, bL, out_ref).
    Weights bf16 (MXU-native), biases f32, accumulation f32.
    """
    out_ref = refs[-1]
    wb = refs[:-1]
    n_layers = len(wb) // 2

    # f32 -> bf16 cast inside the kernel: free VPU work hidden under the DMA.
    h = x_ref[...].astype(jnp.bfloat16)                   # (TILE_B, d_in)
    for layer in range(n_layers):
        w = wb[2 * layer][...]                            # (K, M) bf16, VMEM-resident
        b = wb[2 * layer + 1][...]                        # (1, M) f32
        acc = jnp.dot(h, w, preferred_element_type=jnp.float32) + b
        if layer < n_layers - 1:
            # f32 ReLU (v5e has no bf16 VPU); cast to bf16 only for the next dot.
            h = jnp.maximum(acc, 0.0).astype(jnp.bfloat16)
        else:
            out_ref[...] = acc.astype(out_ref.dtype)


def prepare_params(params):
    """ONE-TIME weight prep (do this at init time, not per forward call).

    Casts weights to bf16 and biases to f32 rows, and zero-pads the *hidden*
    feature dims up to a multiple of 128 lanes (exact math). The layer-0 K dim
    and the final embedding dim stay dense so the forward needs neither an
    x-padding pass nor an output slice pass.

    params: list of (W, b) with W:(in, out), b:(out,).
    Returns a flat tuple (w0, b0, w1, b1, ...).
    """
    n_layers = len(params)
    dims = [params[0][0].shape[0]] + [w.shape[1] for (w, _) in params]
    dims_p = list(dims)
    for i in range(1, n_layers):          # pad hidden dims only
        dims_p[i] = _round_up(dims[i], 128)

    flat = []
    for i, (w, b) in enumerate(params):
        k, m = w.shape
        kp, mp = dims_p[i], dims_p[i + 1]
        w_p = jnp.zeros((kp, mp), jnp.bfloat16).at[:k, :m].set(w.astype(jnp.bfloat16))
        b_p = jnp.zeros((1, mp), jnp.float32).at[0, :m].set(b.astype(jnp.float32))
        flat += [w_p, b_p]
    return tuple(flat)


@functools.partial(jax.jit, static_argnames=("tile_b",))
def encoder_forward(x, flat_wb, *, tile_b=1024):
    """x: (N, input_dim) f32. flat_wb: output of prepare_params()."""
    n, d_in = x.shape
    n_layers = len(flat_wb) // 2
    e = flat_wb[-1].shape[-1]             # embedding_dim (dense, unpadded)

    # Batch tile: multiple of 8 sublanes, large to amortize per-step overhead,
    # split so the grid keeps >=2 "parallel" steps for v7x's two TensorCores.
    tb = min(tile_b, _round_up(n, 8))
    if n > 8 and pl.cdiv(n, tb) < 2:
        tb = _round_up(pl.cdiv(n, 2), 8)
    grid = (pl.cdiv(n, tb),)              # ragged last tile: Pallas masks OOB rows

    in_specs = [pl.BlockSpec((tb, d_in), lambda i: (i, 0))]
    for j in range(n_layers):
        w, b = flat_wb[2 * j], flat_wb[2 * j + 1]
        # Constant index_map -> weights/biases stay resident in VMEM across tiles.
        in_specs += [
            pl.BlockSpec(w.shape, lambda i: (0, 0)),
            pl.BlockSpec(b.shape, lambda i: (0, 0)),
        ]

    return pl.pallas_call(
        _mlp_kernel,
        out_shape=jax.ShapeDtypeStruct((n, e), jnp.float32),
        grid=grid,
        in_specs=in_specs,
        out_specs=pl.BlockSpec((tb, e), lambda i: (i, 0)),
        compiler_params=pltpu.CompilerParams(
            dimension_semantics=("parallel",)),
    )(x, *flat_wb)


def _reference_f32(x, params):
    """Plain-JAX f32 reference mirroring the PyTorch forward."""
    h = x.astype(jnp.float32)
    for layer, (w, b) in enumerate(params):
        h = h @ w.astype(jnp.float32) + b.astype(jnp.float32)
        if layer < len(params) - 1:
            h = jnp.maximum(h, 0.0)
    return h


def _reference_bf16(x, params):
    """Mirrors the kernel's bf16-MXU / f32-accumulate math exactly."""
    h = x.astype(jnp.bfloat16)
    out = None
    for layer, (w, b) in enumerate(params):
        acc = jnp.dot(h, w.astype(jnp.bfloat16),
                      preferred_element_type=jnp.float32) + b.astype(jnp.float32)
        if layer < len(params) - 1:
            h = jnp.maximum(acc, 0.0).astype(jnp.bfloat16)
        else:
            out = acc
    return out


if __name__ == "__main__":
    key = jax.random.PRNGKey(0)

    batch, input_dim, embedding_dim = 8, 32, 32
    layers = (128, 128, 128)

    # PyTorch-style Linear init: U(-1/sqrt(fan_in), 1/sqrt(fan_in)).
    dims = (input_dim,) + layers + (embedding_dim,)
    params = []
    for layer in range(len(dims) - 1):
        key, kw, kb = jax.random.split(key, 3)
        bound = 1.0 / float(dims[layer]) ** 0.5
        w = jax.random.uniform(kw, (dims[layer], dims[layer + 1]), jnp.float32,
                               -bound, bound)
        b = jax.random.uniform(kb, (dims[layer + 1],), jnp.float32, -bound, bound)
        params.append((w, b))

    key, kx = jax.random.split(key)
    x = jax.random.normal(kx, (batch, input_dim), dtype=jnp.float32)

    # One-time weight prep (hoisted out of the forward path).
    flat_wb = jax.block_until_ready(prepare_params(params))

    out = jax.block_until_ready(encoder_forward(x, flat_wb))
    assert out.shape == (batch, embedding_dim), out.shape

    ref_bf16 = jax.block_until_ready(_reference_bf16(x, params))
    assert jnp.allclose(out, ref_bf16, rtol=1e-3, atol=1e-3), \
        float(jnp.max(jnp.abs(out - ref_bf16)))

    ref_f32 = jax.block_until_ready(_reference_f32(x, params))
    assert jnp.allclose(out, ref_f32, rtol=5e-2, atol=5e-2), \
        float(jnp.max(jnp.abs(out - ref_f32)))

    print("KERNEL_OK")
</pallas_src>

<mosaic_0001>
module attributes {stable_mosaic.version = 11 : i64} {
  func.func @_mlp_kernel(%arg0: i32, %arg1: memref<8x32xf32, #tpu.memory_space<vmem>>, %arg2: memref<32x128xbf16, #tpu.memory_space<vmem>>, %arg3: memref<1x128xf32, #tpu.memory_space<vmem>>, %arg4: memref<128x128xbf16, #tpu.memory_space<vmem>>, %arg5: memref<1x128xf32, #tpu.memory_space<vmem>>, %arg6: memref<128x128xbf16, #tpu.memory_space<vmem>>, %arg7: memref<1x128xf32, #tpu.memory_space<vmem>>, %arg8: memref<128x32xbf16, #tpu.memory_space<vmem>>, %arg9: memref<1x32xf32, #tpu.memory_space<vmem>>, %arg10: memref<8x32xf32, #tpu.memory_space<vmem>>) attributes {dimension_semantics = [#tpu.dimension_semantics<parallel>], iteration_bounds = array<i64: 1>, scalar_prefetch = 0 : i64, scratch_operands = 0 : i64, tpu.core_type = #tpu.core_type<tc>, window_params = [{transform_indices = @transform_0, window_bounds = array<i64: 8, 32>}, {pipeline_mode = #tpu.pipeline_mode<synchronous>, transform_indices = @transform_1, window_bounds = array<i64: 32, 128>}, {pipeline_mode = #tpu.pipeline_mode<synchronous>, transform_indices = @transform_2, window_bounds = array<i64: 1, 128>}, {pipeline_mode = #tpu.pipeline_mode<synchronous>, transform_indices = @transform_3, window_bounds = array<i64: 128, 128>}, {pipeline_mode = #tpu.pipeline_mode<synchronous>, transform_indices = @transform_4, window_bounds = array<i64: 1, 128>}, {pipeline_mode = #tpu.pipeline_mode<synchronous>, transform_indices = @transform_5, window_bounds = array<i64: 128, 128>}, {pipeline_mode = #tpu.pipeline_mode<synchronous>, transform_indices = @transform_6, window_bounds = array<i64: 1, 128>}, {pipeline_mode = #tpu.pipeline_mode<synchronous>, transform_indices = @transform_7, window_bounds = array<i64: 128, 32>}, {pipeline_mode = #tpu.pipeline_mode<synchronous>, transform_indices = @transform_8, window_bounds = array<i64: 1, 32>}, {transform_indices = @transform_9, window_bounds = array<i64: 8, 32>}]} {
    %c0 = arith.constant 0 : index
    %c0_0 = arith.constant 0 : index
    %0 = vector.load %arg1[%c0, %c0_0] : memref<8x32xf32, #tpu.memory_space<vmem>>, vector<8x32xf32>
    %1 = arith.truncf %0 : vector<8x32xf32> to vector<8x32xbf16>
    %c0_1 = arith.constant 0 : index
    %c0_2 = arith.constant 0 : index
    %2 = vector.load %arg2[%c0_1, %c0_2] : memref<32x128xbf16, #tpu.memory_space<vmem>>, vector<32x128xbf16>
    %c0_3 = arith.constant 0 : index
    %c0_4 = arith.constant 0 : index
    %3 = vector.load %arg3[%c0_3, %c0_4] : memref<1x128xf32, #tpu.memory_space<vmem>>, vector<1x128xf32>
    %cst = arith.constant dense<0.000000e+00> : vector<8x128xf32>
    %4 = tpu.matmul %1, %2, %cst {dimension_numbers = #tpu.dot_dimension_numbers<[1], [0], [0], [1], [0, 0, 1, 1], [], []>} : vector<8x32xbf16>, vector<32x128xbf16>, vector<8x128xf32> -> vector<8x128xf32>
    %5 = vector.broadcast %3 : vector<1x128xf32> to vector<8x128xf32>
    %6 = arith.addf %4, %5 : vector<8x128xf32>
    %cst_5 = arith.constant 0.000000e+00 : f32
    %7 = vector.broadcast %cst_5 : f32 to vector<8x128xf32>
    %8 = arith.maximumf %6, %7 : vector<8x128xf32>
    %9 = arith.truncf %8 : vector<8x128xf32> to vector<8x128xbf16>
    %c0_6 = arith.constant 0 : index
    %c0_7 = arith.constant 0 : index
    %10 = vector.load %arg4[%c0_6, %c0_7] : memref<128x128xbf16, #tpu.memory_space<vmem>>, vector<128x128xbf16>
    %c0_8 = arith.constant 0 : index
    %c0_9 = arith.constant 0 : index
    %11 = vector.load %arg5[%c0_8, %c0_9] : memref<1x128xf32, #tpu.memory_space<vmem>>, vector<1x128xf32>
    %cst_10 = arith.constant dense<0.000000e+00> : vector<8x128xf32>
    %12 = tpu.matmul %9, %10, %cst_10 {dimension_numbers = #tpu.dot_dimension_numbers<[1], [0], [0], [1], [0, 0, 1, 1], [], []>} : vector<8x128xbf16>, vector<128x128xbf16>, vector<8x128xf32> -> vector<8x128xf32>
    %13 = vector.broadcast %11 : vector<1x128xf32> to vector<8x128xf32>
    %14 = arith.addf %12, %13 : vector<8x128xf32>
    %cst_11 = arith.constant 0.000000e+00 : f32
    %15 = vector.broadcast %cst_11 : f32 to vector<8x128xf32>
    %16 = arith.maximumf %14, %15 : vector<8x128xf32>
    %17 = arith.truncf %16 : vector<8x128xf32> to vector<8x128xbf16>
    %c0_12 = arith.constant 0 : index
    %c0_13 = arith.constant 0 : index
    %18 = vector.load %arg6[%c0_12, %c0_13] : memref<128x128xbf16, #tpu.memory_space<vmem>>, vector<128x128xbf16>
    %c0_14 = arith.constant 0 : index
    %c0_15 = arith.constant 0 : index
    %19 = vector.load %arg7[%c0_14, %c0_15] : memref<1x128xf32, #tpu.memory_space<vmem>>, vector<1x128xf32>
    %cst_16 = arith.constant dense<0.000000e+00> : vector<8x128xf32>
    %20 = tpu.matmul %17, %18, %cst_16 {dimension_numbers = #tpu.dot_dimension_numbers<[1], [0], [0], [1], [0, 0, 1, 1], [], []>} : vector<8x128xbf16>, vector<128x128xbf16>, vector<8x128xf32> -> vector<8x128xf32>
    %21 = vector.broadcast %19 : vector<1x128xf32> to vector<8x128xf32>
    %22 = arith.addf %20, %21 : vector<8x128xf32>
    %cst_17 = arith.constant 0.000000e+00 : f32
    %23 = vector.broadcast %cst_17 : f32 to vector<8x128xf32>
    %24 = arith.maximumf %22, %23 : vector<8x128xf32>
    %25 = arith.truncf %24 : vector<8x128xf32> to vector<8x128xbf16>
    %c0_18 = arith.constant 0 : index
    %c0_19 = arith.constant 0 : index
    %26 = vector.load %arg8[%c0_18, %c0_19] : memref<128x32xbf16, #tpu.memory_space<vmem>>, vector<128x32xbf16>
    %c0_20 = arith.constant 0 : index
    %c0_21 = arith.constant 0 : index
    %27 = vector.load %arg9[%c0_20, %c0_21] : memref<1x32xf32, #tpu.memory_space<vmem>>, vector<1x32xf32>
    %cst_22 = arith.constant dense<0.000000e+00> : vector<8x32xf32>
    %28 = tpu.matmul %25, %26, %cst_22 {dimension_numbers = #tpu.dot_dimension_numbers<[1], [0], [0], [1], [0, 0, 1, 1], [], []>} : vector<8x128xbf16>, vector<128x32xbf16>, vector<8x32xf32> -> vector<8x32xf32>
    %29 = vector.broadcast %27 : vector<1x32xf32> to vector<8x32xf32>
    %30 = arith.addf %28, %29 : vector<8x32xf32>
    %c0_23 = arith.constant 0 : index
    %c0_24 = arith.constant 0 : index
    %31 = vector.load %arg10[%c0_23, %c0_24] : memref<8x32xf32, #tpu.memory_space<vmem>>, vector<8x32xf32>
    tpu.vector_store %arg10[%c0_23, %c0_24], %30 {strides = array<i32>} : memref<8x32xf32, #tpu.memory_space<vmem>>, vector<8x32xf32>,
    return
  }
  func.func @transform_0(%arg0: i32) -> (i32, i32) {
    %c0_i32 = arith.constant 0 : i32
    %c0_i32_0 = arith.constant 0 : i32
    return %arg0, %c0_i32 : i32, i32
  }
  func.func @transform_1(%arg0: i32) -> (i32, i32) {
    %c0_i32 = arith.constant 0 : i32
    %c0_i32_0 = arith.constant 0 : i32
    %c0_i32_1 = arith.constant 0 : i32
    return %c0_i32, %c0_i32_0 : i32, i32
  }
  func.func @transform_2(%arg0: i32) -> (i32, i32) {
    %c0_i32 = arith.constant 0 : i32
    %c0_i32_0 = arith.constant 0 : i32
    %c0_i32_1 = arith.constant 0 : i32
    return %c0_i32, %c0_i32_0 : i32, i32
  }
  func.func @transform_3(%arg0: i32) -> (i32, i32) {
    %c0_i32 = arith.constant 0 : i32
    %c0_i32_0 = arith.constant 0 : i32
    %c0_i32_1 = arith.constant 0 : i32
    return %c0_i32, %c0_i32_0 : i32, i32
  }
  func.func @transform_4(%arg0: i32) -> (i32, i32) {
    %c0_i32 = arith.constant 0 : i32
    %c0_i32_0 = arith.constant 0 : i32
    %c0_i32_1 = arith.constant 0 : i32
    return %c0_i32, %c0_i32_0 : i32, i32
  }
  func.func @transform_5(%arg0: i32) -> (i32, i32) {
    %c0_i32 = arith.constant 0 : i32
    %c0_i32_0 = arith.constant 0 : i32
    %c0_i32_1 = arith.constant 0 : i32
    return %c0_i32, %c0_i32_0 : i32, i32
  }
  func.func @transform_6(%arg0: i32) -> (i32, i32) {
    %c0_i32 = arith.constant 0 : i32
    %c0_i32_0 = arith.constant 0 : i32
    %c0_i32_1 = arith.constant 0 : i32
    return %c0_i32, %c0_i32_0 : i32, i32
  }
  func.func @transform_7(%arg0: i32) -> (i32, i32) {
    %c0_i32 = arith.constant 0 : i32
    %c0_i32_0 = arith.constant 0 : i32
    %c0_i32_1 = arith.constant 0 : i32
    return %c0_i32, %c0_i32_0 : i32, i32
  }
  func.func @transform_8(%arg0: i32) -> (i32, i32) {
    %c0_i32 = arith.constant 0 : i32
    %c0_i32_0 = arith.constant 0 : i32
    %c0_i32_1 = arith.constant 0 : i32
    return %c0_i32, %c0_i32_0 : i32, i32
  }
  func.func @transform_9(%arg0: i32) -> (i32, i32) {
    %c0_i32 = arith.constant 0 : i32
    %c0_i32_0 = arith.constant 0 : i32
    return %arg0, %c0_i32 : i32, i32
  }
}

</mosaic_0001>

<bundles_post_ra>
// kernel: encoder_forward.1
= control target key start
LH: loop header
LB: loop body
LE: loop exit
PB: predicated region body
PF: predicated region fallthrough
CT: control target
= control target key end

     0   :  { %14 = vsyncpa [#allocation3], 0  ;;  %s914_s0 = inlined_call_operand.vmem [shape: f32[8,32], index: 0, kind: input, shape index: {}]   ;;  %s915_s1 = inlined_call_operand.vmem [shape: bf16[32,128], index: 1, kind: input, shape index: {}]   ;;  %s916_s2 = inlined_call_operand.vmem [shape: f32[1,128], index: 2, kind: input, shape index: {}]   ;;  %s917_s3 = inlined_call_operand.vmem [shape: bf16[128,128], index: 3, kind: input, shape index: {}]   ;;  %s918_s4 = inlined_call_operand.vmem [shape: f32[1,128], index: 4, kind: input, shape index: {}]   ;;  %s919_s5 = inlined_call_operand.hbm [shape: bf16[128,128], index: 5, kind: input, shape index: {}]   ;;  %s920_s6 = inlined_call_operand.hbm [shape: f32[1,128], index: 6, kind: input, shape index: {}]   ;;  %s921_s7 = inlined_call_operand.vmem [shape: bf16[128,32], index: 7, kind: input, shape index: {}]   ;;  %s922_s8 = inlined_call_operand.vmem [shape: f32[1,32], index: 8, kind: input, shape index: {}]   ;;  %s923_s9 = inlined_call_operand.hbm [shape: f32[8,32], index: 9, kind: output, shape index: {}]  }
   0x1   :  { %15 = vsyncpa [#allocation6], 0 }
   0x2   :  { %16 = vsyncpa [#allocation4], 0  ;;  %s719_s30 = smov [#allocation2]   ;;  %s647_s13 = scalar_lea.hbm %s919_s5, 1024 }
   0x3   :  { %s32_s10 = sshll.u32 %s719_s30, 4  ;;  %p648_p0 = scmp.ne.s32.totalorder %s919_s5, %s647_s13  ;;  %s33_s10 = int_to_ptr.vmem [resolvable:$true] %s32_s10 }
   0x4   :  { %p651_p1 = scmp.lt.u32.totalorder %s647_s13, %s919_s5 }
   0x6   :  { %p653_p2 = pnand %p651_p1, %p648_p0 }
   0x8   :  { %656 = shalt.err (!%p653_p2)
}
   0x9   :  { %s657_s18 = scalar_lea.vmem %s33_s10, 1024  ;;  %p662_p4 = scmp.lt.s32.totalorder %s33_s10, %s33_s10 }
   0xa   :  { %p658_p3 = scmp.ne.s32.totalorder %s33_s10, %s657_s18  ;;  %p663_p5 = scmp.lt.s32.totalorder %s657_s18, %s657_s18 }
   0xc   :  { %p664_p6 = por %p663_p5, %p662_p4 }
   0xe   :  { %p665_p7 = pnand %p664_p6, %p658_p3 }
  0x10   :  { %668 = shalt.err (!%p665_p7)
}
  0x11   :  { %s720_s19 = smov 64   ;;  %s721_s20 = smov 4  }
  0x12   :  { %38 = dma.hbm_to_vmem [thread:$0]  %s919_s5, 1024, %s33_s10, [#allocation3], %s720_s19, %s720_s19, %s721_s20  }
  0x13   :  { %s722_s23 = smov [#allocation5]   ;;  %s669_s27 = scalar_lea.hbm %s920_s6, 16 }
  0x14   :  { %s45_s24 = sshll.u32 %s722_s23, 4  ;;  %p670_p8 = scmp.ne.s32.totalorder %s920_s6, %s669_s27  ;;  %s46_s24 = int_to_ptr.vmem [resolvable:$true] %s45_s24 }
  0x15   :  { %p673_p9 = scmp.lt.u32.totalorder %s669_s27, %s920_s6 }
  0x17   :  { %p675_p10 = pnand %p673_p9, %p670_p8 }
  0x19   :  { %678 = shalt.err (!%p675_p10)
}
  0x1a   :  { %s679_s12 = scalar_lea.vmem %s46_s24, 16  ;;  %s683_s5 = scalar_lea.vmem %s46_s24, 32 }
  0x1b   :  { %p680_p11 = scmp.ne.s32.totalorder %s46_s24, %s679_s12  ;;  %p684_p12 = scmp.lt.s32.totalorder %s46_s24, %s46_s24 }
  0x1c   :  { %p685_p13 = scmp.lt.s32.totalorder %s683_s5, %s679_s12 }
  0x1e   :  { %p686_p0 = por %p685_p13, %p684_p12 }
  0x20   :  { %p687_p1 = pnand %p686_p0, %p680_p11 }
  0x22   :  { %690 = shalt.err (!%p687_p1)
}
  0x23   :  { %48 = dma.hbm_to_vmem [thread:$0]  %s920_s6, 16, %s46_s24, [#allocation6]  }
  0x24   :  { %713 = dma.done.wait [#allocation3], 1024  }
  0x25   :  { %714 = vsyncadd [#allocation3], 4294966272 }
  0x26   :  { %715 = dma.done.wait [#allocation6], 16  }
  0x27   :  { %716 = vsyncadd [#allocation6], 4294967280  ;;  %v723_v0 = vmov 0.0   ;;  %vm724_vm0 = vmmov 0   ;;  %v621_v1 = vld [vmem:[%s915_s1] sm:$0xff]   ;;  %v622_v2 = vld [vmem:[%s915_s1 + $0x8] sm:$0xff]  }
  0x28   :  { %546 = vmatprep.subr.bf16.mxu0 %v723_v0  ;;  %550 = vmatprep.mubr.msk.bf16.mxu0 %vm724_vm0, %v723_v0  ;;  %v60_v3 = vld [vmem:[%s914_s0] sm:$0xff]  ;;  %v624_v6 = vld [vmem:[%s917_s3 + $0x8] sm:$0xff]   ;;  %vm85_vm1 = vcmask 261120   ;;  %v625_v7 = vld [vmem:[%s917_s3 + $0x10] sm:$0xff]   ;;  %s725_s27 = smov [#allocation7]  }
  0x29   :  { %554 = vmatprep.subr.bf16.mxu1 %v723_v0  ;;  %570 = vmatprep.mubr.msk.bf16.mxu1 %vm724_vm0, %v723_v0  ;;  %v623_v4 = vld [vmem:[%s917_s3] sm:$0xff]   ;;  %v61_v5 = vpack.c.bf16 %v60_v3, %v60_v3  ;;  %v626_v8 = vld [vmem:[%s917_s3 + $0x18] sm:$0xff]   ;;  %v628_v10 = vld [vmem:[%s917_s3 + $0x28] sm:$0xff]   ;;  %s475_s28 = sshll.u32 %s725_s27, 4  ;;  %s476_s28 = int_to_ptr.vmem [resolvable:$true] %s475_s28 }
  0x2a   :  { %547 = vmatpush3.bf16.msra.mxu0 %v621_v1  ;;  %555 = vmatpush3.bf16.msra.mxu1 %v623_v4  ;;  %v627_v9 = vld [vmem:[%s917_s3 + $0x20] sm:$0xff]   ;;  %v629_v11 = vld [vmem:[%s917_s3 + $0x30] sm:$0xff]   ;;  %v630_v12 = vld [vmem:[%s917_s3 + $0x38] sm:$0xff]   ;;  %p696_p3 = scmp.lt.s32.totalorder %s476_s28, %s476_s28 }
  0x2b   :  { %548 = vmatprep.subr.bf16.mxu0 %v723_v0  ;;  %556 = vmatprep.subr.bf16.mxu1 %v723_v0  ;;  %v631_v13 = vld [vmem:[#allocation2] sm:$0xff]   ;;  %v632_v14 = vld [vmem:[#allocation2 + $0x8] sm:$0xff]   ;;  %v633_v15 = vld [vmem:[#allocation2 + $0x10] sm:$0xff]  }
  0x2c   :  { %v634_v16 = vld [vmem:[#allocation2 + $0x18] sm:$0xff]   ;;  %v635_v17 = vld [vmem:[#allocation2 + $0x20] sm:$0xff]   ;;  %v636_v18 = vld [vmem:[#allocation2 + $0x28] sm:$0xff]  }
  0x2d   :  { %v485_v19 = vld [vmem:[%s916_s2] ss:$0 sm:$0xff]  ;;  %v637_v27 = vld [vmem:[#allocation2 + $0x30] sm:$0xff]   ;;  %v638_v28 = vld [vmem:[#allocation2 + $0x38] sm:$0xff]  }
  0x2e   :  { %549 = vmatpush3.bf16.msra.mxu0 %v622_v2  ;;  %557 = vmatpush3.bf16.msra.mxu1 %v624_v6  ;;  %v639_v29 = vld [vmem:[%s921_s7] sm:$0xff]   ;;  %v640_v30 = vld [vmem:[%s921_s7 + $0x8] sm:$0xff]   ;;  %v641_v31 = vld [vmem:[%s921_s7 + $0x10] sm:$0xff]  }
  0x2f   :  { %574 = vmatprep.subr.bf16.mxu0 %v723_v0  ;;  %558 = vmatprep.subr.bf16.mxu1 %v723_v0  ;;  %v642_v32 = vld [vmem:[%s921_s7 + $0x18] sm:$0xff]   ;;  %v643_v33 = vld [vmem:[%s921_s7 + $0x20] sm:$0xff]   ;;  %v644_v34 = vld [vmem:[%s921_s7 + $0x28] sm:$0xff]  }
  0x30   :  { %v489_v35 = vld [vmem:[%s918_s4] ss:$0 sm:$0xff]  ;;  %v645_v43 = vld [vmem:[%s921_s7 + $0x30] sm:$0xff]   ;;  %v646_v44 = vld [vmem:[%s921_s7 + $0x38] sm:$0xff]   ;;  %s691_s7 = scalar_lea.vmem %s476_s28, 128 }
  0x31   :  { %551 = vmatmul.mubr.msk.bf16.vlgmr.msra.gmra.mrb[0].mxu0 %vm85_vm1, %v61_v5  ;;  %v498_v45 = vld [vmem:[#allocation5] ss:$0 sm:$0xff]  ;;  %p692_p2 = scmp.ne.s32.totalorder %s476_s28, %s691_s7  ;;  %p697_p4 = scmp.lt.s32.totalorder %s691_s7, %s691_s7 }
  0x32   :  { %590 = vmatprep.mubr.msk.bf16.mxu0 %vm724_vm0, %v723_v0  ;;  %559 = vmatpush3.bf16.msra.mxu1 %v625_v7  ;;  %v507_v53 = vld [vmem:[%s922_s8] ss:$0 sm:$0xff] }
  0x33   :  { %560 = vmatprep.subr.bf16.mxu1 %v723_v0  ;;  %575 = vmatpush3.bf16.msra.mxu0 %v631_v13  ;;  %p698_p5 = por %p697_p4, %p696_p3 }
  0x34   :  { %576 = vmatprep.subr.bf16.mxu0 %v723_v0 }
  0x35   :  { %p699_p6 = pnand %p698_p5, %p692_p2 }
  0x36   :  { %561 = vmatpush3.bf16.msra.mxu1 %v626_v8 }
  0x37   :  { %562 = vmatprep.subr.bf16.mxu1 %v723_v0  ;;  %577 = vmatpush3.bf16.msra.mxu0 %v632_v14 }
  0x38   :  { %578 = vmatprep.subr.bf16.mxu0 %v723_v0 }
  0x3a   :  { %563 = vmatpush3.bf16.msra.mxu1 %v627_v9 }
  0x3b   :  { %564 = vmatprep.subr.bf16.mxu1 %v723_v0  ;;  %579 = vmatpush3.bf16.msra.mxu0 %v633_v15 }
  0x3c   :  { %580 = vmatprep.subr.bf16.mxu0 %v723_v0 }
  0x3e   :  { %565 = vmatpush3.bf16.msra.mxu1 %v628_v10 }
  0x3f   :  { %566 = vmatprep.subr.bf16.mxu1 %v723_v0  ;;  %581 = vmatpush3.bf16.msra.mxu0 %v634_v16 }
  0x40   :  { %582 = vmatprep.subr.bf16.mxu0 %v723_v0 }
  0x42   :  { %567 = vmatpush3.bf16.msra.mxu1 %v629_v11 }
  0x43   :  { %568 = vmatprep.subr.bf16.mxu1 %v723_v0  ;;  %583 = vmatpush3.bf16.msra.mxu0 %v635_v17 }
  0x44   :  { %584 = vmatprep.subr.bf16.mxu0 %v723_v0 }
  0x46   :  { %569 = vmatpush3.bf16.msra.mxu1 %v630_v12 }
  0x47   :  { %594 = vmatprep.subr.bf16.mxu1 %v723_v0  ;;  %585 = vmatpush3.bf16.msra.mxu0 %v636_v18 }
  0x48   :  { %586 = vmatprep.subr.bf16.mxu0 %v723_v0 }
  0x4b   :  { %587 = vmatpush3.bf16.msra.mxu0 %v637_v27 }
  0x4c   :  { %588 = vmatprep.subr.bf16.mxu0 %v723_v0 }
  0x4f   :  { %589 = vmatpush3.bf16.msra.mxu0 %v638_v28 }
 0x104   :  { %v123_v20 = vpop.f32.mrb[0].mxu0 }
 0x105   :  { %v124_v21 = vadd.f32 %v485_v19, %v123_v20  ;;  %v552_v22 = vpop.f32.mrb[1].mxu0 }
 0x106   :  { %v126_v23 = vpop.f32.mrb[2].mxu0 }
 0x107   :  { %v129_v24 = vmax.f32 %v124_v21, 0.0  ;;  %v553_v25 = vpop.f32.mrb[3].mxu0 }
 0x109   :  { %v130_v26 = vpack.c.bf16 %v129_v24, %v129_v24 }
 0x10b   :  { %571 = vmatmul.mubr.bf16.vlgmr.msra.gmra.mrb[0].mxu1 %v130_v26 }
 0x10c   :  { %610 = vmatprep.mubr.msk.bf16.mxu1 %vm724_vm0, %v723_v0  ;;  %595 = vmatpush3.bf16.msra.mxu1 %v639_v29 }
 0x10d   :  { %596 = vmatprep.subr.bf16.mxu1 %v723_v0 }
 0x110   :  { %597 = vmatpush3.bf16.msra.mxu1 %v640_v30 }
 0x111   :  { %598 = vmatprep.subr.bf16.mxu1 %v723_v0 }
 0x114   :  { %599 = vmatpush3.bf16.msra.mxu1 %v641_v31 }
 0x115   :  { %600 = vmatprep.subr.bf16.mxu1 %v723_v0 }
 0x118   :  { %601 = vmatpush3.bf16.msra.mxu1 %v642_v32 }
 0x119   :  { %602 = vmatprep.subr.bf16.mxu1 %v723_v0 }
 0x11c   :  { %603 = vmatpush3.bf16.msra.mxu1 %v643_v33 }
 0x11d   :  { %604 = vmatprep.subr.bf16.mxu1 %v723_v0 }
 0x120   :  { %605 = vmatpush3.bf16.msra.mxu1 %v644_v34 }
 0x121   :  { %606 = vmatprep.subr.bf16.mxu1 %v723_v0 }
 0x124   :  { %607 = vmatpush3.bf16.msra.mxu1 %v645_v43 }
 0x125   :  { %608 = vmatprep.subr.bf16.mxu1 %v723_v0 }
 0x128   :  { %609 = vmatpush3.bf16.msra.mxu1 %v646_v44 }
 0x1de   :  { %v236_v36 = vpop.f32.mrb[0].mxu1 }
 0x1df   :  { %v237_v37 = vadd.f32 %v489_v35, %v236_v36  ;;  %v572_v38 = vpop.f32.mrb[1].mxu1 }
 0x1e0   :  { %v239_v39 = vpop.f32.mrb[2].mxu1 }
 0x1e1   :  { %v242_v40 = vmax.f32 %v237_v37, 0.0  ;;  %v573_v41 = vpop.f32.mrb[3].mxu1 }
 0x1e3   :  { %v243_v42 = vpack.c.bf16 %v242_v40, %v242_v40 }
 0x1e5   :  { %591 = vmatmul.mubr.bf16.vlgmr.msra.gmra.mrb[4].mxu0 %v243_v42 }
 0x2b8   :  { %v349_v46 = vpop.f32.mrb[4].mxu0 }
 0x2b9   :  { %v350_v47 = vadd.f32 %v498_v45, %v349_v46  ;;  %v592_v48 = vpop.f32.mrb[5].mxu0 }
 0x2ba   :  { %v352_v49 = vpop.f32.mrb[6].mxu0 }
 0x2bb   :  { %v355_v50 = vmax.f32 %v350_v47, 0.0  ;;  %v593_v51 = vpop.f32.mrb[7].mxu0 }
 0x2bd   :  { %v356_v52 = vpack.c.bf16 %v355_v50, %v355_v50 }
 0x2bf   :  { %611 = vmatmul.mubr.bf16.vlgmr.msra.gmra.mrb[4].mxu1 %v356_v52 }
 0x392   :  { %v462_v54 = vpop.f32.mrb[4].mxu1 }
 0x393   :  { %v463_v55 = vadd.f32 %v507_v53, %v462_v54  ;;  %v612_v56 = vpop.f32.mrb[5].mxu1 }
 0x394   :  { %v465_v57 = vpop.f32.mrb[6].mxu1 }
 0x395   :  { %468 = vst.msk [vmem:[#allocation7] sm:$0xff] %vm85_vm1, %v463_v55  ;;  %v613_v58 = vpop.f32.mrb[7].mxu1 }
 0x396   :  { %702 = shalt.err (!%p699_p6)
}
 0x397   :  { %s703_s8 = scalar_lea.hbm %s923_s9, 128 }
 0x398   :  { %p704_p7 = scmp.ne.s32.totalorder %s923_s9, %s703_s8  ;;  %p707_p8 = scmp.lt.u32.totalorder %s703_s8, %s923_s9 }
 0x39a   :  { %p709_p9 = pnand %p707_p8, %p704_p7 }
 0x39c   :  { %712 = shalt.err (!%p709_p9)
}
 0x39d   :  { %478 = dma.vmem_to_hbm [thread:$0]  %s476_s28, 128, %s923_s9, [#allocation4]  }
 0x39e   :  { %717 = dma.done.wait [#allocation4], 128  }
 0x39f   :  { %718 = vsyncadd [#allocation4], 4294967168 }
 0x3a0   :  { %482 = vsyncpa [#allocation3], 1 }
 0x3a1   :  { %483 = vsyncpa [#allocation6], 1 }
 0x3a2   :  { %484 = vsyncpa [#allocation4], 1 }

</bundles_post_ra>
